<compile_context>
chip_gen: v7x
topology: tpu7x:2x2x1
jax: 0.10.0
libtpu: 0.0.40
codegen_flags: <defaults>
</compile_context>

<pallas_src>
import jax
import jax.numpy as jnp
from jax.experimental import pallas as pl
from jax.experimental.pallas import tpu as pltpu


D_IN, D_H1, D_H2, D_OUT = 784, 256, 128, 10


def _mlp_kernel(x_ref, w1_ref, b1_ref, w2_ref, b2_ref, w3_ref, b3_ref, o_ref):
    # x tile arrives in its HBM dtype (typically f32); cast to bf16 in-kernel so the
    # wrapper never materializes a bf16 copy of the whole batch in HBM.
    x = x_ref[...].astype(jnp.bfloat16)

    # fc1 + relu : (TB, 784) @ (784, 256), f32 accumulation on the MXU.
    h1 = jnp.dot(x, w1_ref[...], preferred_element_type=jnp.float32) + b1_ref[...]
    h1 = jnp.maximum(h1, 0.0).astype(jnp.bfloat16)

    # fc2 + relu : (TB, 256) @ (256, 128)
    h2 = jnp.dot(h1, w2_ref[...], preferred_element_type=jnp.float32) + b2_ref[...]
    h2 = jnp.maximum(h2, 0.0).astype(jnp.bfloat16)

    # fc3 (logits, no activation) : (TB, 128) @ (128, 10)
    out = jnp.dot(h2, w3_ref[...], preferred_element_type=jnp.float32) + b3_ref[...]
    o_ref[...] = out.astype(o_ref.dtype)


def _cdiv(a, b):
    return -(-a // b)


def _round_up(n, m):
    return _cdiv(n, m) * m


def _choose_batch_tile(B, block_b):
    """Batch tile: multiple of 8 (f32 sublane), capped at block_b, and arranged so the
    grid has >=2 (preferably an even number of) steps whenever B allows it, so v7x's
    two TensorCores both get balanced work and DMA/compute overlap exists."""
    tb = max(8, min(_round_up(block_b, 8), _round_up(B, 8)))
    steps = _cdiv(B, tb)
    if steps < 2 and B > 8:
        tb = max(8, _round_up(_cdiv(B, 2), 8))
        steps = _cdiv(B, tb)
    if steps > 1 and steps % 2 == 1:
        tb_even = max(8, _round_up(_cdiv(B, steps + 1), 8))
        if _cdiv(B, tb_even) % 2 == 0:
            tb = tb_even
    return tb


def simple_nn_forward(x, params, *, block_b=2048):
    """SimpleNN forward. x: any shape whose trailing dims flatten to 784 (e.g.
    (B, 1, 28, 28)), any float dtype. Returns (B, 10) float32 logits.

    block_b: max batch tile. 2048 keeps the double-buffered f32 x tiles (~12.8 MiB) +
    resident bf16 weights (~1 MiB) + f32 intermediates comfortably under the 32 MiB
    vmem limit we request below, on every generation (v5e/v6e/v7x)."""
    w1, b1, w2, b2, w3, b3 = params

    x2d = x.reshape(-1, D_IN)                 # == torch's x.view(-1, 784)
    B = x2d.shape[0]
    tb = _choose_batch_tile(B, block_b)
    grid = (_cdiv(B, tb),)                    # ragged last tile: Pallas partial-block masking

    # Weights in bf16 (full MXU rate, half the HBM/VMEM footprint); biases stay f32 so
    # the bias-add / ReLU run on the f32 accumulator.
    w1b, w2b, w3b = (w.astype(jnp.bfloat16) for w in (w1, w2, w3))
    b1f, b2f, b3f = (b.astype(jnp.float32) for b in (b1, b2, b3))

    # Constant index_map -> block never moves -> weights stay VMEM-resident across the
    # whole grid (Mosaic does not re-fetch an unchanged block).
    const = lambda shape: pl.BlockSpec(shape, lambda i: (0, 0))

    n_wparams = D_IN * D_H1 + D_H1 * D_H2 + D_H2 * D_OUT
    cost = pl.CostEstimate(
        flops=2 * B * n_wparams,
        transcendentals=0,
        bytes_accessed=(B * D_IN * x2d.dtype.itemsize      # activation read
                        + B * D_OUT * 4                    # logits write
                        + 2 * n_wparams                    # bf16 weights
                        + 4 * (D_H1 + D_H2 + D_OUT)),      # f32 biases
    )

    out = pl.pallas_call(
        _mlp_kernel,
        out_shape=jax.ShapeDtypeStruct((B, D_OUT), jnp.float32),
        grid=grid,
        in_specs=[
            pl.BlockSpec((tb, D_IN), lambda i: (i, 0)),     # x tile, pipelined over batch
            const((D_IN, D_H1)), const((1, D_H1)),          # fc1
            const((D_H1, D_H2)), const((1, D_H2)),          # fc2
            const((D_H2, D_OUT)), const((1, D_OUT)),        # fc3
        ],
        out_specs=pl.BlockSpec((tb, D_OUT), lambda i: (i, 0)),
        compiler_params=pltpu.CompilerParams(
            dimension_semantics=("parallel",),              # shard batch tiles across TCs
            vmem_limit_bytes=32 * 1024 * 1024,              # cover v5e's 16 MiB default
        ),
        cost_estimate=cost,
    )(x2d, w1b, b1f, w2b, b2f, w3b, b3f)

    return out


def init_params(key):
    """Deterministic init mimicking torch.nn.Linear default U(-1/sqrt(fan_in), +).
    Weights stored as (in_features, out_features); biases as (1, out_features)."""
    dims = [(D_IN, D_H1), (D_H1, D_H2), (D_H2, D_OUT)]
    params = []
    for fan_in, fan_out in dims:
        key, kw, kb = jax.random.split(key, 3)
        bound = 1.0 / jnp.sqrt(float(fan_in))
        w = jax.random.uniform(kw, (fan_in, fan_out), jnp.float32, -bound, bound)
        b = jax.random.uniform(kb, (1, fan_out), jnp.float32, -bound, bound)
        params += [w, b]
    return tuple(params)


if __name__ == "__main__":
    key = jax.random.PRNGKey(0)
    key, kx = jax.random.split(key)

    params = init_params(key)

    # Small MNIST-like batch: (B, 1, 28, 28); forward flattens to (B, 784).
    x = jax.random.normal(kx, (8, 1, 28, 28), jnp.float32)

    out = jax.block_until_ready(simple_nn_forward(x, params))

    # Pure-JAX reference using the same bf16-input / f32-accumulate recipe.
    w1, b1, w2, b2, w3, b3 = params
    xr = x.reshape(-1, D_IN).astype(jnp.bfloat16)
    h1 = jnp.maximum(
        jnp.dot(xr, w1.astype(jnp.bfloat16), preferred_element_type=jnp.float32) + b1, 0.0
    ).astype(jnp.bfloat16)
    h2 = jnp.maximum(
        jnp.dot(h1, w2.astype(jnp.bfloat16), preferred_element_type=jnp.float32) + b2, 0.0
    ).astype(jnp.bfloat16)
    ref = jnp.dot(h2, w3.astype(jnp.bfloat16), preferred_element_type=jnp.float32) + b3

    assert out.shape == (8, 10), out.shape
    err = float(jnp.max(jnp.abs(out - ref)))
    assert jnp.allclose(out, ref, atol=2e-2, rtol=2e-2), err
    print("KERNEL_OK")
</pallas_src>

<mosaic_0001>
module attributes {stable_mosaic.version = 11 : i64} {
  func.func @_mlp_kernel(%arg0: i32, %arg1: memref<8x784xf32, #tpu.memory_space<vmem>>, %arg2: memref<784x256xbf16, #tpu.memory_space<vmem>>, %arg3: memref<1x256xf32, #tpu.memory_space<vmem>>, %arg4: memref<256x128xbf16, #tpu.memory_space<vmem>>, %arg5: memref<1x128xf32, #tpu.memory_space<vmem>>, %arg6: memref<128x10xbf16, #tpu.memory_space<vmem>>, %arg7: memref<1x10xf32, #tpu.memory_space<vmem>>, %arg8: memref<8x10xf32, #tpu.memory_space<vmem>>) attributes {dimension_semantics = [#tpu.dimension_semantics<parallel>], iteration_bounds = array<i64: 1>, scalar_prefetch = 0 : i64, scratch_operands = 0 : i64, tpu.core_type = #tpu.core_type<tc>, window_params = [{transform_indices = @transform_0, window_bounds = array<i64: 8, 784>}, {pipeline_mode = #tpu.pipeline_mode<synchronous>, transform_indices = @transform_1, window_bounds = array<i64: 784, 256>}, {pipeline_mode = #tpu.pipeline_mode<synchronous>, transform_indices = @transform_2, window_bounds = array<i64: 1, 256>}, {pipeline_mode = #tpu.pipeline_mode<synchronous>, transform_indices = @transform_3, window_bounds = array<i64: 256, 128>}, {pipeline_mode = #tpu.pipeline_mode<synchronous>, transform_indices = @transform_4, window_bounds = array<i64: 1, 128>}, {pipeline_mode = #tpu.pipeline_mode<synchronous>, transform_indices = @transform_5, window_bounds = array<i64: 128, 10>}, {pipeline_mode = #tpu.pipeline_mode<synchronous>, transform_indices = @transform_6, window_bounds = array<i64: 1, 10>}, {transform_indices = @transform_7, window_bounds = array<i64: 8, 10>}]} {
    %c0 = arith.constant 0 : index
    %c0_0 = arith.constant 0 : index
    %0 = vector.load %arg1[%c0, %c0_0] : memref<8x784xf32, #tpu.memory_space<vmem>>, vector<8x784xf32>
    %1 = arith.truncf %0 : vector<8x784xf32> to vector<8x784xbf16>
    %c0_1 = arith.constant 0 : index
    %c0_2 = arith.constant 0 : index
    %2 = vector.load %arg2[%c0_1, %c0_2] : memref<784x256xbf16, #tpu.memory_space<vmem>>, vector<784x256xbf16>
    %cst = arith.constant dense<0.000000e+00> : vector<8x256xf32>
    %3 = tpu.matmul %1, %2, %cst {dimension_numbers = #tpu.dot_dimension_numbers<[1], [0], [0], [1], [0, 0, 1, 1], [], []>} : vector<8x784xbf16>, vector<784x256xbf16>, vector<8x256xf32> -> vector<8x256xf32>
    %c0_3 = arith.constant 0 : index
    %c0_4 = arith.constant 0 : index
    %4 = vector.load %arg3[%c0_3, %c0_4] : memref<1x256xf32, #tpu.memory_space<vmem>>, vector<1x256xf32>
    %5 = vector.broadcast %4 : vector<1x256xf32> to vector<8x256xf32>
    %6 = arith.addf %3, %5 : vector<8x256xf32>
    %cst_5 = arith.constant 0.000000e+00 : f32
    %7 = vector.broadcast %cst_5 : f32 to vector<8x256xf32>
    %8 = arith.maximumf %6, %7 : vector<8x256xf32>
    %9 = arith.truncf %8 : vector<8x256xf32> to vector<8x256xbf16>
    %c0_6 = arith.constant 0 : index
    %c0_7 = arith.constant 0 : index
    %10 = vector.load %arg4[%c0_6, %c0_7] : memref<256x128xbf16, #tpu.memory_space<vmem>>, vector<256x128xbf16>
    %cst_8 = arith.constant dense<0.000000e+00> : vector<8x128xf32>
    %11 = tpu.matmul %9, %10, %cst_8 {dimension_numbers = #tpu.dot_dimension_numbers<[1], [0], [0], [1], [0, 0, 1, 1], [], []>} : vector<8x256xbf16>, vector<256x128xbf16>, vector<8x128xf32> -> vector<8x128xf32>
    %c0_9 = arith.constant 0 : index
    %c0_10 = arith.constant 0 : index
    %12 = vector.load %arg5[%c0_9, %c0_10] : memref<1x128xf32, #tpu.memory_space<vmem>>, vector<1x128xf32>
    %13 = vector.broadcast %12 : vector<1x128xf32> to vector<8x128xf32>
    %14 = arith.addf %11, %13 : vector<8x128xf32>
    %cst_11 = arith.constant 0.000000e+00 : f32
    %15 = vector.broadcast %cst_11 : f32 to vector<8x128xf32>
    %16 = arith.maximumf %14, %15 : vector<8x128xf32>
    %17 = arith.truncf %16 : vector<8x128xf32> to vector<8x128xbf16>
    %c0_12 = arith.constant 0 : index
    %c0_13 = arith.constant 0 : index
    %18 = vector.load %arg6[%c0_12, %c0_13] : memref<128x10xbf16, #tpu.memory_space<vmem>>, vector<128x10xbf16>
    %cst_14 = arith.constant dense<0.000000e+00> : vector<8x10xf32>
    %19 = tpu.matmul %17, %18, %cst_14 {dimension_numbers = #tpu.dot_dimension_numbers<[1], [0], [0], [1], [0, 0, 1, 1], [], []>} : vector<8x128xbf16>, vector<128x10xbf16>, vector<8x10xf32> -> vector<8x10xf32>
    %c0_15 = arith.constant 0 : index
    %c0_16 = arith.constant 0 : index
    %20 = vector.load %arg7[%c0_15, %c0_16] : memref<1x10xf32, #tpu.memory_space<vmem>>, vector<1x10xf32>
    %21 = vector.broadcast %20 : vector<1x10xf32> to vector<8x10xf32>
    %22 = arith.addf %19, %21 : vector<8x10xf32>
    %c0_17 = arith.constant 0 : index
    %c0_18 = arith.constant 0 : index
    %23 = vector.load %arg8[%c0_17, %c0_18] : memref<8x10xf32, #tpu.memory_space<vmem>>, vector<8x10xf32>
    tpu.vector_store %arg8[%c0_17, %c0_18], %22 {strides = array<i32>} : memref<8x10xf32, #tpu.memory_space<vmem>>, vector<8x10xf32>,
    return
  }
  func.func @transform_0(%arg0: i32) -> (i32, i32) {
    %c0_i32 = arith.constant 0 : i32
    %c0_i32_0 = arith.constant 0 : i32
    return %arg0, %c0_i32 : i32, i32
  }
  func.func @transform_1(%arg0: i32) -> (i32, i32) {
    %c0_i32 = arith.constant 0 : i32
    %c0_i32_0 = arith.constant 0 : i32
    %c0_i32_1 = arith.constant 0 : i32
    return %c0_i32, %c0_i32_0 : i32, i32
  }
  func.func @transform_2(%arg0: i32) -> (i32, i32) {
    %c0_i32 = arith.constant 0 : i32
    %c0_i32_0 = arith.constant 0 : i32
    %c0_i32_1 = arith.constant 0 : i32
    return %c0_i32, %c0_i32_0 : i32, i32
  }
  func.func @transform_3(%arg0: i32) -> (i32, i32) {
    %c0_i32 = arith.constant 0 : i32
    %c0_i32_0 = arith.constant 0 : i32
    %c0_i32_1 = arith.constant 0 : i32
    return %c0_i32, %c0_i32_0 : i32, i32
  }
  func.func @transform_4(%arg0: i32) -> (i32, i32) {
    %c0_i32 = arith.constant 0 : i32
    %c0_i32_0 = arith.constant 0 : i32
    %c0_i32_1 = arith.constant 0 : i32
    return %c0_i32, %c0_i32_0 : i32, i32
  }
  func.func @transform_5(%arg0: i32) -> (i32, i32) {
    %c0_i32 = arith.constant 0 : i32
    %c0_i32_0 = arith.constant 0 : i32
    %c0_i32_1 = arith.constant 0 : i32
    return %c0_i32, %c0_i32_0 : i32, i32
  }
  func.func @transform_6(%arg0: i32) -> (i32, i32) {
    %c0_i32 = arith.constant 0 : i32
    %c0_i32_0 = arith.constant 0 : i32
    %c0_i32_1 = arith.constant 0 : i32
    return %c0_i32, %c0_i32_0 : i32, i32
  }
  func.func @transform_7(%arg0: i32) -> (i32, i32) {
    %c0_i32 = arith.constant 0 : i32
    %c0_i32_0 = arith.constant 0 : i32
    return %arg0, %c0_i32 : i32, i32
  }
}

</mosaic_0001>

<bundles_post_ra>
// kernel: tpu_custom_call.1
= control target key start
LH: loop header
LB: loop body
LE: loop exit
PB: predicated region body
PF: predicated region fallthrough
CT: control target
= control target key end

     0   :  { %12 = vsyncpa [#allocation3], 0  ;;  %s1729_s0 = inlined_call_operand.vmem [shape: f32[8,784], index: 0, kind: input, shape index: {}]   ;;  %s1730_s1 = inlined_call_operand.hbm [shape: bf16[784,256], index: 1, kind: input, shape index: {}]   ;;  %s1731_s2 = inlined_call_operand.vmem [shape: f32[1,256], index: 2, kind: input, shape index: {}]   ;;  %s1732_s3 = inlined_call_operand.hbm [shape: bf16[256,128], index: 3, kind: input, shape index: {}]   ;;  %s1733_s4 = inlined_call_operand.vmem [shape: f32[1,128], index: 4, kind: input, shape index: {}]   ;;  %s1734_s5 = inlined_call_operand.vmem [shape: bf16[128,10], index: 5, kind: input, shape index: {}]   ;;  %s1735_s6 = inlined_call_operand.vmem [shape: f32[1,10], index: 6, kind: input, shape index: {}]   ;;  %s1736_s7 = inlined_call_operand.hbm [shape: f32[8,10], index: 7, kind: output, shape index: {}]  }
   0x1   :  { %13 = vsyncpa [#allocation6], 0 }
   0x2   :  { %14 = vsyncpa [#allocation4], 0  ;;  %s1589_s24 = smov [#allocation2]   ;;  %s1517_s28 = scalar_lea.hbm %s1730_s1, 12544 }
   0x3   :  { %s22_s25 = sshll.u32 %s1589_s24, 4  ;;  %p1518_p0 = scmp.ne.s32.totalorder %s1730_s1, %s1517_s28  ;;  %s23_s25 = int_to_ptr.vmem [resolvable:$true] %s22_s25 }
   0x4   :  { %p1521_p1 = scmp.lt.u32.totalorder %s1517_s28, %s1730_s1 }
   0x6   :  { %p1523_p2 = pnand %p1521_p1, %p1518_p0 }
   0x8   :  { %1526 = shalt.err (!%p1523_p2)
}
   0x9   :  { %s1527_s10 = scalar_lea.vmem %s23_s25, 12544  ;;  %p1532_p4 = scmp.lt.s32.totalorder %s23_s25, %s23_s25 }
   0xa   :  { %p1528_p3 = scmp.ne.s32.totalorder %s23_s25, %s1527_s10  ;;  %p1533_p5 = scmp.lt.s32.totalorder %s1527_s10, %s1527_s10 }
   0xc   :  { %p1534_p6 = por %p1533_p5, %p1532_p4 }
   0xe   :  { %p1535_p7 = pnand %p1534_p6, %p1528_p3 }
  0x10   :  { %1538 = shalt.err (!%p1535_p7)
}
  0x11   :  { %s1590_s11 = smov 128   ;;  %s1591_s12 = smov 8  }
  0x12   :  { %28 = dma.hbm_to_vmem [thread:$0]  %s1730_s1, 12544, %s23_s25, [#allocation3], %s1590_s11, %s1590_s11, %s1591_s12  }
  0x13   :  { %s1592_s15 = smov [#allocation5]   ;;  %s1539_s19 = scalar_lea.hbm %s1732_s3, 2048 }
  0x14   :  { %s36_s16 = sshll.u32 %s1592_s15, 4  ;;  %p1540_p8 = scmp.ne.s32.totalorder %s1732_s3, %s1539_s19  ;;  %s37_s16 = int_to_ptr.vmem [resolvable:$true] %s36_s16 }
  0x15   :  { %p1543_p9 = scmp.lt.u32.totalorder %s1539_s19, %s1732_s3 }
  0x17   :  { %p1545_p10 = pnand %p1543_p9, %p1540_p8 }
  0x19   :  { %1548 = shalt.err (!%p1545_p10)
}
  0x1a   :  { %s1549_s24 = scalar_lea.vmem %s37_s16, 2048  ;;  %p1554_p12 = scmp.lt.s32.totalorder %s37_s16, %s37_s16 }
  0x1b   :  { %p1550_p11 = scmp.ne.s32.totalorder %s37_s16, %s1549_s24  ;;  %p1555_p13 = scmp.lt.s32.totalorder %s1549_s24, %s1549_s24 }
  0x1d   :  { %p1556_p0 = por %p1555_p13, %p1554_p12 }
  0x1f   :  { %p1557_p1 = pnand %p1556_p0, %p1550_p11 }
  0x21   :  { %1560 = shalt.err (!%p1557_p1)
}
  0x22   :  { %s1593_s1 = smov 64   ;;  %s1594_s25 = smov 4  }
  0x23   :  { %42 = dma.hbm_to_vmem [thread:$0]  %s1732_s3, 2048, %s37_s16, [#allocation6], %s1593_s1, %s1593_s1, %s1594_s25  }
  0x24   :  { %1583 = dma.done.wait [#allocation3], 12544  }
  0x25   :  { %1584 = vsyncadd [#allocation3], 4294954752 }
  0x26   :  { %1585 = dma.done.wait [#allocation6], 2048  }
  0x27   :  { %1586 = vsyncadd [#allocation6], 4294965248  ;;  %v1346_v0 = vld [vmem:[#allocation2 + $0x104] ss:$8 sps:$4 sm:$0xff]   ;;  %v1348_v1 = vld [vmem:[#allocation2 + $0x100] ss:$8 sps:$4 sm:$0xff]  }
  0x28   :  { %715 = vmatprep.subr.bf16.mxu0 %v1346_v0  ;;  %v1349_v2 = vld [vmem:[#allocation2 + $0x114] ss:$8 sps:$4 sm:$0xff]   ;;  %v1351_v3 = vld [vmem:[#allocation2 + $0x110] ss:$8 sps:$4 sm:$0xff]   ;;  %v1352_v4 = vld [vmem:[#allocation2 + $0x124] ss:$8 sps:$4 sm:$0xff]  }
  0x29   :  { %716 = vmatpush1.bf16.msra.mxu0 %v1348_v1  ;;  %v1354_v5 = vld [vmem:[#allocation2 + $0x120] ss:$8 sps:$4 sm:$0xff]   ;;  %v1355_v6 = vld [vmem:[#allocation2 + $0x134] ss:$8 sps:$4 sm:$0xff]   ;;  %v1357_v7 = vld [vmem:[#allocation2 + $0x130] ss:$8 sps:$4 sm:$0xff]  }
  0x2a   :  { %717 = vmatprep.subr.bf16.mxu0 %v1349_v2  ;;  %v1358_v8 = vld [vmem:[#allocation2 + $0x144] ss:$8 sps:$4 sm:$0xff]   ;;  %v1360_v9 = vld [vmem:[#allocation2 + $0x140] ss:$8 sps:$4 sm:$0xff]   ;;  %v1361_v10 = vld [vmem:[#allocation2 + $0x154] ss:$8 sps:$4 sm:$0xff]  }
  0x2b   :  { %v1363_v11 = vld [vmem:[#allocation2 + $0x150] ss:$8 sps:$4 sm:$0xff]   ;;  %v1364_v12 = vld [vmem:[#allocation2 + $0x164] ss:$8 sps:$4 sm:$0xff]   ;;  %v1366_v15 = vld [vmem:[#allocation2 + $0x160] ss:$8 sps:$4 sm:$0xff]  }
  0x2c   :  { %v59_v13 = vld [vmem:[%s1729_s0 + $0x18] sm:$0xff]  ;;  %v1400_v17 = vld [vmem:[#allocation2 + $0x4] ss:$8 sps:$4 sm:$0xff]   ;;  %v1405_v20 = vld [vmem:[#allocation2] ss:$8 sps:$4 sm:$0xff]   ;;  %vm670_vm0 = vcmask 130048  }
  0x2d   :  { %718 = vmatpush1.bf16.msra.mxu0 %v1351_v3  ;;  %v66_v14 = vpack.c.bf16 %v59_v13, %v59_v13  ;;  %v1367_v16 = vld [vmem:[#allocation2 + $0x174] ss:$8 sps:$4 sm:$0xff]   ;;  %v1369_v18 = vld [vmem:[#allocation2 + $0x170] ss:$8 sps:$4 sm:$0xff]   ;;  %v1370_v19 = vld [vmem:[#allocation2 + $0x184] ss:$8 sps:$4 sm:$0xff]   ;;  %674 = vmatprep.subr.bf16.mxu1 %v1400_v17 }
  0x2e   :  { %719 = vmatprep.subr.bf16.mxu0 %v1352_v4  ;;  %v1406_v21 = vld [vmem:[#allocation2 + $0x14] ss:$8 sps:$4 sm:$0xff]   ;;  %675 = vmatpush1.bf16.msra.mxu1 %v1405_v20  ;;  %v1411_v22 = vld [vmem:[#allocation2 + $0x10] ss:$8 sps:$4 sm:$0xff]   ;;  %v1412_v23 = vld [vmem:[#allocation2 + $0x24] ss:$8 sps:$4 sm:$0xff]  }
  0x2f   :  { %747 = vmatprep.mubr.bf16.mxu0 %v66_v14  ;;  %676 = vmatprep.subr.bf16.mxu1 %v1406_v21  ;;  %v1372_v24 = vld [vmem:[#allocation2 + $0x180] ss:$8 sps:$4 sm:$0xff]   ;;  %v1373_v25 = vld [vmem:[#allocation2 + $0x194] ss:$8 sps:$4 sm:$0xff]   ;;  %v1375_v28 = vld [vmem:[#allocation2 + $0x190] ss:$8 sps:$4 sm:$0xff]  }
  0x30   :  { %v1417_v26 = vld [vmem:[#allocation2 + $0x20] ss:$8 sps:$4 sm:$0xff]   ;;  %v1418_v27 = vld [vmem:[#allocation2 + $0x34] ss:$8 sps:$4 sm:$0xff]   ;;  %v1376_v29 = vld [vmem:[#allocation2 + $0x1a4] ss:$8 sps:$4 sm:$0xff]  }
  0x31   :  { %720 = vmatpush1.bf16.msra.mxu0 %v1354_v5  ;;  %v1423_v30 = vld [vmem:[#allocation2 + $0x30] ss:$8 sps:$4 sm:$0xff]   ;;  %v1424_v31 = vld [vmem:[#allocation2 + $0x44] ss:$8 sps:$4 sm:$0xff]   ;;  %v1378_v32 = vld [vmem:[#allocation2 + $0x1a0] ss:$8 sps:$4 sm:$0xff]  }
  0x32   :  { %721 = vmatprep.subr.bf16.mxu0 %v1355_v6  ;;  %677 = vmatpush1.bf16.msra.mxu1 %v1411_v22  ;;  %v1379_v33 = vld [vmem:[#allocation2 + $0x1b4] ss:$8 sps:$4 sm:$0xff]   ;;  %v1429_v34 = vld [vmem:[#allocation2 + $0x40] ss:$8 sps:$4 sm:$0xff]   ;;  %v1381_v36 = vld [vmem:[#allocation2 + $0x1b0] ss:$8 sps:$4 sm:$0xff]  }
  0x33   :  { %678 = vmatprep.subr.bf16.mxu1 %v1412_v23  ;;  %v1430_v35 = vld [vmem:[#allocation2 + $0x54] ss:$8 sps:$4 sm:$0xff]   ;;  %v1382_v37 = vld [vmem:[#allocation2 + $0x1c4] ss:$8 sps:$4 sm:$0xff]   ;;  %v1435_v38 = vld [vmem:[#allocation2 + $0x50] ss:$8 sps:$4 sm:$0xff]  }
  0x34   :  { %v1436_v39 = vld [vmem:[#allocation2 + $0x64] ss:$8 sps:$4 sm:$0xff]   ;;  %v1384_v40 = vld [vmem:[#allocation2 + $0x1c0] ss:$8 sps:$4 sm:$0xff]   ;;  %v1385_v41 = vld [vmem:[#allocation2 + $0x1d4] ss:$8 sps:$4 sm:$0xff]  }
  0x35   :  { %722 = vmatpush1.bf16.msra.mxu0 %v1357_v7  ;;  %v1441_v42 = vld [vmem:[#allocation2 + $0x60] ss:$8 sps:$4 sm:$0xff]   ;;  %v1442_v43 = vld [vmem:[#allocation2 + $0x74] ss:$8 sps:$4 sm:$0xff]   ;;  %v1387_v44 = vld [vmem:[#allocation2 + $0x1d0] ss:$8 sps:$4 sm:$0xff]  }
  0x36   :  { %723 = vmatprep.subr.bf16.mxu0 %v1358_v8  ;;  %679 = vmatpush1.bf16.msra.mxu1 %v1417_v26  ;;  %v1388_v45 = vld [vmem:[#allocation2 + $0x1e4] ss:$8 sps:$4 sm:$0xff]   ;;  %v1447_v46 = vld [vmem:[#allocation2 + $0x70] ss:$8 sps:$4 sm:$0xff]   ;;  %v1390_v48 = vld [vmem:[#allocation2 + $0x1e0] ss:$8 sps:$4 sm:$0xff]  }
  0x37   :  { %680 = vmatprep.subr.bf16.mxu1 %v1418_v27  ;;  %v1448_v47 = vld [vmem:[#allocation2 + $0x84] ss:$8 sps:$4 sm:$0xff]   ;;  %v1391_v49 = vld [vmem:[#allocation2 + $0x1f4] ss:$8 sps:$4 sm:$0xff]   ;;  %v1453_v50 = vld [vmem:[#allocation2 + $0x80] ss:$8 sps:$4 sm:$0xff]  }
  0x38   :  { %v1393_v51 = vld [vmem:[#allocation2 + $0x1f0] ss:$8 sps:$4 sm:$0xff]   ;;  %v1454_v52 = vld [vmem:[#allocation2 + $0x94] ss:$8 sps:$4 sm:$0xff]   ;;  %v1396_v54 = vld [vmem:[#allocation2 + $0x204] ss:$8 sps:$4 sm:$0xff]  }
  0x39   :  { %724 = vmatpush1.bf16.msra.mxu0 %v1360_v9  ;;  %v58_v53 = vld [vmem:[%s1729_s0 + $0x10] sm:$0xff]  ;;  %v1460_v56 = vld [vmem:[#allocation2 + $0xa4] ss:$8 sps:$4 sm:$0xff]   ;;  %v1394_v59 = vld [vmem:[#allocation2 + $0x200] ss:$8 sps:$4 sm:$0xff]   ;;  %vm1597_vm1 = vmmov 0  }
  0x3a   :  { %725 = vmatprep.subr.bf16.mxu0 %v1361_v10  ;;  %681 = vmatpush1.bf16.msra.mxu1 %v1423_v30  ;;  %v1459_v55 = vld [vmem:[#allocation2 + $0x90] ss:$8 sps:$4 sm:$0xff]   ;;  %v65_v57 = vpack.c.bf16 %v58_v53, %v58_v53  ;;  %v61_v58 = vld [vmem:[%s1729_s0 + $0x28] sm:$0xff]  ;;  %v1399_v61 = vld [vmem:[#allocation2 + $0x214] ss:$8 sps:$4 sm:$0xff]   ;;  %vm1130_vm2 = vcmask 80896  }
  0x3b   :  { %682 = vmatprep.subr.bf16.mxu1 %v1424_v31  ;;  %v68_v60 = vpack.c.bf16 %v61_v58, %v61_v58  ;;  %v1465_v62 = vld [vmem:[#allocation2 + $0xa0] ss:$8 sps:$4 sm:$0xff]   ;;  %v1466_v63 = vld [vmem:[#allocation2 + $0xb4] ss:$8 sps:$4 sm:$0xff]   ;;  %v1397_v1 = vld [vmem:[#allocation2 + $0x210] ss:$8 sps:$4 sm:$0xff]  }
  0x3c   :  { %v57_v0 = vld [vmem:[%s1729_s0 + $0x8] sm:$0xff]  ;;  %v1471_v4 = vld [vmem:[#allocation2 + $0xb0] ss:$8 sps:$4 sm:$0xff]   ;;  %v1410_v7 = vld [vmem:[#allocation2 + $0x234] ss:$8 sps:$4 sm:$0xff]  }
  0x3d   :  { %726 = vmatpush1.bf16.msra.mxu0 %v1363_v11  ;;  %v64_v2 = vpack.c.bf16 %v57_v0, %v57_v0  ;;  %v1404_v3 = vld [vmem:[#allocation2 + $0x224] ss:$8 sps:$4 sm:$0xff]   ;;  %v1402_v6 = vld [vmem:[#allocation2 + $0x220] ss:$8 sps:$4 sm:$0xff]   ;;  %v1478_v9 = vld [vmem:[#allocation2 + $0xd4] ss:$8 sps:$4 sm:$0xff]  }
  0x3e   :  { %727 = vmatprep.subr.bf16.mxu0 %v1364_v12  ;;  %683 = vmatpush1.bf16.msra.mxu1 %v1429_v34  ;;  %v1472_v5 = vld [vmem:[#allocation2 + $0xc4] ss:$8 sps:$4 sm:$0xff]   ;;  %v1477_v8 = vld [vmem:[#allocation2 + $0xc0] ss:$8 sps:$4 sm:$0xff]   ;;  %v1408_v10 = vld [vmem:[#allocation2 + $0x230] ss:$8 sps:$4 sm:$0xff]  }
  0x3f   :  { %684 = vmatprep.subr.bf16.mxu1 %v1430_v35  ;;  %706 = vmatprep.mubr.bf16.mxu1 %v64_v2  ;;  %v1416_v11 = vld [vmem:[#allocation2 + $0x244] ss:$8 sps:$4 sm:$0xff]   ;;  %v1414_v12 = vld [vmem:[#allocation2 + $0x240] ss:$8 sps:$4 sm:$0xff]   ;;  %v1483_v13 = vld [vmem:[#allocation2 + $0xd0] ss:$8 sps:$4 sm:$0xff]  }
  0x40   :  { %v1484_v14 = vld [vmem:[#allocation2 + $0xe4] ss:$8 sps:$4 sm:$0xff]   ;;  %v1490_v17 = vld [vmem:[#allocation2 + $0xf4] ss:$8 sps:$4 sm:$0xff]   ;;  %v1492_v20 = vld [vmem:[#allocation2 + $0xf0] ss:$8 sps:$4 sm:$0xff]  }
  0x41   :  { %728 = vmatpush1.bf16.msra.mxu0 %v1366_v15  ;;  %v1422_v15 = vld [vmem:[#allocation2 + $0x254] ss:$8 sps:$4 sm:$0xff]   ;;  %v56_v21 = vld [vmem:[%s1729_s0] sm:$0xff]  ;;  %v1499_v35 = vld [vmem:[#allocation5 + $0x58] sm:$0xff]  }
  0x42   :  { %729 = vmatprep.subr.bf16.mxu0 %v1367_v16  ;;  %685 = vmatpush1.bf16.msra.mxu1 %v1435_v38  ;;  %v1489_v16 = vld [vmem:[#allocation2 + $0xe0] ss:$8 sps:$4 sm:$0xff]   ;;  %v1493_v22 = vld [vmem:[#allocation5 + $0x40] sm:$0xff]   ;;  %v1495_v27 = vld [vmem:[#allocation5 + $0x48] sm:$0xff]  }
  0x43   :  { %686 = vmatprep.subr.bf16.mxu1 %v1436_v39  ;;  %v1426_v23 = vld [vmem:[#allocation2 + $0x260] ss:$8 sps:$4 sm:$0xff]   ;;  %v1494_v26 = vld [vmem:[#allocation5] sm:$0xff]   ;;  %v1496_v30 = vld [vmem:[#allocation5 + $0x8] sm:$0xff]  }
  0x44   :  { %v1497_v31 = vld [vmem:[#allocation5 + $0x50] sm:$0xff]   ;;  %v1500_v38 = vld [vmem:[#allocation5 + $0x18] sm:$0xff]   ;;  %v1501_v39 = vld [vmem:[#allocation5 + $0x60] sm:$0xff]  }
  0x45   :  { %730 = vmatpush1.bf16.msra.mxu0 %v1369_v18  ;;  %v1420_v18 = vld [vmem:[#allocation2 + $0x250] ss:$8 sps:$4 sm:$0xff]   ;;  %v1498_v34 = vld [vmem:[#allocation5 + $0x10] sm:$0xff]   ;;  %v1508_v0 = vld [vmem:[#allocation5 + $0x38] sm:$0xff]  }
  0x46   :  { %731 = vmatprep.subr.bf16.mxu0 %v1370_v19  ;;  %687 = vmatpush1.bf16.msra.mxu1 %v1441_v42  ;;  %v1428_v19 = vld [vmem:[#allocation2 + $0x264] ss:$8 sps:$4 sm:$0xff]   ;;  %v1502_v42 = vld [vmem:[#allocation5 + $0x20] sm:$0xff]  }
  0x47   :  { %688 = vmatprep.subr.bf16.mxu1 %v1442_v43  ;;  %v1456_v43 = vld [vmem:[#allocation2 + $0x2b0] ss:$8 sps:$4 sm:$0xff]   ;;  %v1488_v53 = vld [vmem:[#allocation2 + $0x304] ss:$8 sps:$4 sm:$0xff]  }
  0x49   :  { %732 = vmatpush1.bf16.msra.mxu0 %v1372_v24  ;;  %v1434_v24 = vld [vmem:[#allocation2 + $0x274] ss:$8 sps:$4 sm:$0xff]  }
  0x4a   :  { %733 = vmatprep.subr.bf16.mxu0 %v1373_v25  ;;  %689 = vmatpush1.bf16.msra.mxu1 %v1447_v46  ;;  %v63_v25 = vpack.c.bf16 %v56_v21, %v56_v21  ;;  %v1470_v46 = vld [vmem:[#allocation2 + $0x2d4] ss:$8 sps:$4 sm:$0xff]  }
  0x4b   :  { %690 = vmatprep.subr.bf16.mxu1 %v1448_v47  ;;  %v1468_v47 = vld [vmem:[#allocation2 + $0x2d0] ss:$8 sps:$4 sm:$0xff]  }
  0x4d   :  { %734 = vmatpush1.bf16.msra.mxu0 %v1375_v28  ;;  %v1432_v28 = vld [vmem:[#allocation2 + $0x270] ss:$8 sps:$4 sm:$0xff]  }
  0x4e   :  { %735 = vmatprep.subr.bf16.mxu0 %v1376_v29  ;;  %691 = vmatpush1.bf16.msra.mxu1 %v1453_v50  ;;  %v1440_v29 = vld [vmem:[#allocation2 + $0x284] ss:$8 sps:$4 sm:$0xff]   ;;  %v1482_v50 = vld [vmem:[#allocation2 + $0x2f4] ss:$8 sps:$4 sm:$0xff]  }
  0x4f   :  { %692 = vmatprep.subr.bf16.mxu1 %v1454_v52  ;;  %v60_v52 = vld [vmem:[%s1729_s0 + $0x20] sm:$0xff] }
  0x51   :  { %736 = vmatpush1.bf16.msra.mxu0 %v1378_v32  ;;  %v1438_v32 = vld [vmem:[#allocation2 + $0x280] ss:$8 sps:$4 sm:$0xff]  }
  0x52   :  { %737 = vmatprep.subr.bf16.mxu0 %v1379_v33  ;;  %693 = vmatpush1.bf16.msra.mxu1 %v1459_v55  ;;  %v1446_v33 = vld [vmem:[#allocation2 + $0x294] ss:$8 sps:$4 sm:$0xff]   ;;  %v1486_v55 = vld [vmem:[#allocation2 + $0x300] ss:$8 sps:$4 sm:$0xff]  }
  0x53   :  { %694 = vmatprep.subr.bf16.mxu1 %v1460_v56  ;;  %v1595_v56 = vmov 0  }
  0x55   :  { %738 = vmatpush1.bf16.msra.mxu0 %v1381_v36  ;;  %v1444_v36 = vld [vmem:[#allocation2 + $0x290] ss:$8 sps:$4 sm:$0xff]  }
  0x56   :  { %739 = vmatprep.subr.bf16.mxu0 %v1382_v37  ;;  %695 = vmatpush1.bf16.msra.mxu1 %v1465_v62  ;;  %v1452_v37 = vld [vmem:[#allocation2 + $0x2a4] ss:$8 sps:$4 sm:$0xff]  }
  0x57   :  { %696 = vmatprep.subr.bf16.mxu1 %v1466_v63  ;;  %v1506_v62 = vld [vmem:[#allocation5 + $0x30] sm:$0xff]   ;;  %v1507_v63 = vld [vmem:[#allocation5 + $0x78] sm:$0xff]  }
  0x59   :  { %740 = vmatpush1.bf16.msra.mxu0 %v1384_v40  ;;  %v1450_v40 = vld [vmem:[#allocation2 + $0x2a0] ss:$8 sps:$4 sm:$0xff]  }
  0x5a   :  { %741 = vmatprep.subr.bf16.mxu0 %v1385_v41  ;;  %697 = vmatpush1.bf16.msra.mxu1 %v1471_v4  ;;  %v1458_v41 = vld [vmem:[#allocation2 + $0x2b4] ss:$8 sps:$4 sm:$0xff]  }
  0x5b   :  { %698 = vmatprep.subr.bf16.mxu1 %v1472_v5 }
  0x5d   :  { %742 = vmatpush1.bf16.msra.mxu0 %v1387_v44  ;;  %v1464_v44 = vld [vmem:[#allocation2 + $0x2c4] ss:$8 sps:$4 sm:$0xff]  }
  0x5e   :  { %743 = vmatprep.subr.bf16.mxu0 %v1388_v45  ;;  %699 = vmatpush1.bf16.msra.mxu1 %v1477_v8  ;;  %v1462_v45 = vld [vmem:[#allocation2 + $0x2c0] ss:$8 sps:$4 sm:$0xff]  }
  0x5f   :  { %700 = vmatprep.subr.bf16.mxu1 %v1478_v9  ;;  %v168_v9 = vld [vmem:[%s1731_s2] sm:$0x3] }
  0x61   :  { %744 = vmatpush1.bf16.msra.mxu0 %v1390_v48  ;;  %v1476_v48 = vld [vmem:[#allocation2 + $0x2e4] ss:$8 sps:$4 sm:$0xff]  }
  0x62   :  { %745 = vmatprep.subr.bf16.mxu0 %v1391_v49  ;;  %701 = vmatpush1.bf16.msra.mxu1 %v1483_v13  ;;  %v1474_v49 = vld [vmem:[#allocation2 + $0x2e0] ss:$8 sps:$4 sm:$0xff]  }
  0x63   :  { %702 = vmatprep.subr.bf16.mxu1 %v1484_v14 }
  0x65   :  { %746 = vmatpush1.bf16.msra.mxu0 %v1393_v51  ;;  %v1480_v51 = vld [vmem:[#allocation2 + $0x2f0] ss:$8 sps:$4 sm:$0xff]  }
  0x66   :  { %756 = vmatprep.subr.bf16.mxu0 %v1396_v54  ;;  %703 = vmatpush1.bf16.msra.mxu1 %v1489_v16  ;;  %v67_v54 = vpack.c.bf16 %v60_v52, %v60_v52 }
  0x67   :  { %704 = vmatprep.subr.bf16.mxu1 %v1490_v17 }
  0x68   :  { %748 = vmatmul.mubr.bf16.vlgmr.msra.gmra.mrb[0].mxu0 %v65_v57  ;;  %v62_v57 = vld [vmem:[%s1729_s0 + $0x30] sm:$0xff] }
  0x69   :  { %757 = vmatpush1.bf16.msra.mxu0 %v1394_v59  ;;  %788 = vmatprep.mubr.bf16.mxu0 %v68_v60  ;;  %v69_v58 = vpack.c.bf16 %v62_v57, %v62_v57  ;;  %v1503_v59 = vld [vmem:[#allocation5 + $0x68] sm:$0xff]  }
  0x6a   :  { %758 = vmatprep.subr.bf16.mxu0 %v1399_v61  ;;  %705 = vmatpush1.bf16.msra.mxu1 %v1492_v20  ;;  %v1504_v60 = vld [vmem:[#allocation5 + $0x28] sm:$0xff]   ;;  %v1505_v61 = vld [vmem:[#allocation5 + $0x70] sm:$0xff]  }
  0x6b   :  { %1273 = vmatprep.subr.bf16.mxu1 %v1493_v22 }
  0x6d   :  { %759 = vmatpush1.bf16.msra.mxu0 %v1397_v1  ;;  %707 = vmatmul.mubr.bf16.vlgmr.msra.gmra.mrb[0].mxu1 %v63_v25  ;;  %v1596_v1 = vmov 0.0  }
  0x6e   :  { %760 = vmatprep.subr.bf16.mxu0 %v1404_v3  ;;  %1274 = vmatpush3.bf16.msra.mxu1 %v1494_v26  ;;  %v1510_v26 = vld [vmem:[%s1734_s5 + $0x8] sm:$0xff]  }
  0x6f   :  { %1275 = vmatprep.subr.bf16.mxu1 %v1495_v27  ;;  %v1511_v27 = vld [vmem:[%s1734_s5 + $0x10] sm:$0xff]  }
  0x71   :  { %761 = vmatpush1.bf16.msra.mxu0 %v1402_v6  ;;  %v170_v6 = vlaneseq }
  0x72   :  { %762 = vmatprep.subr.bf16.mxu0 %v1410_v7  ;;  %1276 = vmatpush3.bf16.msra.mxu1 %v1496_v30  ;;  %v1514_v30 = vld [vmem:[%s1734_s5 + $0x28] sm:$0xff]  }
  0x73   :  { %1277 = vmatprep.subr.bf16.mxu1 %v1497_v31  ;;  %v171_v7 = vshrl.u32 %v170_v6, 7  ;;  %v1515_v31 = vld [vmem:[%s1734_s5 + $0x30] sm:$0xff]  }
  0x75   :  { %763 = vmatpush1.bf16.msra.mxu0 %v1408_v10  ;;  %v172_v8 = vsub.s32 0, %v171_v7  ;;  %v176_v10 = vsub.s32 1, %v171_v7 }
  0x76   :  { %764 = vmatprep.subr.bf16.mxu0 %v1416_v11  ;;  %1278 = vmatpush3.bf16.msra.mxu1 %v1498_v34  ;;  %v1247_v34 = vld [vmem:[%s1733_s4] ss:$0 sm:$0xff] }
  0x77   :  { %1279 = vmatprep.subr.bf16.mxu1 %v1499_v35  ;;  %v173_v11 = vrot.slane %v168_v9, %v172_v8 }
  0x79   :  { %765 = vmatpush1.bf16.msra.mxu0 %v1414_v12  ;;  %v177_v12 = vrot.slane %v168_v9, %v176_v10 }
  0x7a   :  { %766 = vmatprep.subr.bf16.mxu0 %v1422_v15  ;;  %1280 = vmatpush3.bf16.msra.mxu1 %v1500_v38 }
  0x7b   :  { %1281 = vmatprep.subr.bf16.mxu1 %v1501_v39 }
  0x7d   :  { %767 = vmatpush1.bf16.msra.mxu0 %v1420_v18 }
  0x7e   :  { %768 = vmatprep.subr.bf16.mxu0 %v1428_v19  ;;  %1282 = vmatpush3.bf16.msra.mxu1 %v1502_v42  ;;  %v1264_v42 = vld [vmem:[%s1735_s6] ss:$0 sm:$0xff] }
  0x7f   :  { %1283 = vmatprep.subr.bf16.mxu1 %v1503_v59 }
  0x81   :  { %769 = vmatpush1.bf16.msra.mxu0 %v1426_v23 }
  0x82   :  { %770 = vmatprep.subr.bf16.mxu0 %v1434_v24  ;;  %1284 = vmatpush3.bf16.msra.mxu1 %v1504_v60  ;;  %v1509_v24 = vld [vmem:[%s1734_s5] sm:$0xff]  }
  0x83   :  { %1285 = vmatprep.subr.bf16.mxu1 %v1505_v61 }
  0x85   :  { %771 = vmatpush1.bf16.msra.mxu0 %v1432_v28  ;;  %v1512_v28 = vld [vmem:[%s1734_s5 + $0x18] sm:$0xff]  }
  0x86   :  { %772 = vmatprep.subr.bf16.mxu0 %v1440_v29  ;;  %1286 = vmatpush3.bf16.msra.mxu1 %v1506_v62  ;;  %v1513_v29 = vld [vmem:[%s1734_s5 + $0x20] sm:$0xff]  }
  0x87   :  { %1287 = vmatprep.subr.bf16.mxu1 %v1507_v63 }
  0x89   :  { %773 = vmatpush1.bf16.msra.mxu0 %v1438_v32  ;;  %v1516_v32 = vld [vmem:[%s1734_s5 + $0x38] sm:$0xff]   ;;  %s1598_s5 = smov [#allocation7]  }
  0x8a   :  { %774 = vmatprep.subr.bf16.mxu0 %v1446_v33  ;;  %1288 = vmatpush3.bf16.msra.mxu1 %v1508_v0  ;;  %s1138_s13 = sshll.u32 %s1598_s5, 4  ;;  %s1139_s13 = int_to_ptr.vmem [resolvable:$true] %s1138_s13 }
  0x8b   :  { %1304 = vmatprep.subr.bf16.mxu1 %v1596_v1  ;;  %s1561_s4 = scalar_lea.vmem %s1139_s13, 128  ;;  %p1566_p3 = scmp.lt.s32.totalorder %s1139_s13, %s1139_s13 }
  0x8c   :  { %p1562_p2 = scmp.ne.s32.totalorder %s1139_s13, %s1561_s4  ;;  %p1567_p4 = scmp.lt.s32.totalorder %s1561_s4, %s1561_s4 }
  0x8d   :  { %775 = vmatpush1.bf16.msra.mxu0 %v1444_v36 }
  0x8e   :  { %776 = vmatprep.subr.bf16.mxu0 %v1452_v37  ;;  %p1568_p5 = por %p1567_p4, %p1566_p3 }
  0x90   :  { %p1569_p6 = pnand %p1568_p5, %p1562_p2 }
  0x91   :  { %777 = vmatpush1.bf16.msra.mxu0 %v1450_v40 }
  0x92   :  { %778 = vmatprep.subr.bf16.mxu0 %v1458_v41 }
  0x95   :  { %779 = vmatpush1.bf16.msra.mxu0 %v1456_v43 }
  0x96   :  { %780 = vmatprep.subr.bf16.mxu0 %v1464_v44 }
  0x99   :  { %781 = vmatpush1.bf16.msra.mxu0 %v1462_v45 }
  0x9a   :  { %782 = vmatprep.subr.bf16.mxu0 %v1470_v46 }
  0x9d   :  { %783 = vmatpush1.bf16.msra.mxu0 %v1468_v47 }
  0x9e   :  { %784 = vmatprep.subr.bf16.mxu0 %v1476_v48 }
  0xa1   :  { %785 = vmatpush1.bf16.msra.mxu0 %v1474_v49 }
  0xa2   :  { %786 = vmatprep.subr.bf16.mxu0 %v1482_v50 }
  0xa5   :  { %787 = vmatpush1.bf16.msra.mxu0 %v1480_v51 }
  0xa6   :  { %797 = vmatprep.subr.bf16.mxu0 %v1488_v53 }
  0xa8   :  { %789 = vmatmul.mubr.bf16.vlgmr.msra.gmra.mrb[0].mxu0 %v67_v54 }
  0xa9   :  { %798 = vmatpush1.bf16.msra.mxu0 %v1486_v55  ;;  %829 = vmatprep.mubr.bf16.mxu0 %v1595_v56 }
  0xb4   :  { %1246 = vmatmul.mubr.msk.bf16.vlgmr.msra.gmra.mrb[0].mxu0 %vm670_vm0, %v69_v58 }
 0x140   :  { %v708_v2 = vpop.f32.mrb[0].mxu1 }
 0x141   :  { %v710_v3 = vpop.f32.mrb[1].mxu1  ;;  %v709_v13 = vadd.f32 %v708_v2, %v173_v11 }
 0x142   :  { %v712_v4 = vpop.f32.mrb[2].mxu1  ;;  %v711_v14 = vadd.f32 %v710_v3, %v177_v12 }
 0x143   :  { %v713_v5 = vpop.f32.mrb[3].mxu1 }
 0x187   :  { %v831_v15 = vpop.f32.mrb[0].mxu0 }
 0x188   :  { %v1325_v16 = vadd.f32 %v831_v15, %v709_v13  ;;  %v833_v17 = vpop.f32.mrb[1].mxu0 }
 0x189   :  { %v1327_v18 = vadd.f32 %v833_v17, %v711_v14  ;;  %v835_v19 = vpop.f32.mrb[2].mxu0 }
 0x18a   :  { %v838_v20 = vmax.f32 %v1325_v16, 0.0  ;;  %v836_v21 = vpop.f32.mrb[3].mxu0 }
 0x18b   :  { %v839_v22 = vmax.f32 %v1327_v18, 0.0 }
 0x18c   :  { %v840_v25 = vpack.c.bf16 %v838_v20, %v838_v20 }
 0x18d   :  { %v841_v23 = vpack.c.bf16 %v839_v22, %v839_v22 }
 0x18f   :  { %1009 = vmatprep.mubr.bf16.mxu1 %v841_v23 }
 0x190   :  { %1010 = vmatmul.mubr.bf16.vlgmr.msra.gmra.mrb[4].mxu1 %v840_v25 }
 0x191   :  { %1305 = vmatpush3.bf16.msra.mxu1 %v1509_v24  ;;  %1320 = vmatprep.mubr.msk.bf16.mxu1 %vm1597_vm1, %v1596_v1 }
 0x192   :  { %1306 = vmatprep.subr.bf16.mxu1 %v1596_v1 }
 0x195   :  { %1307 = vmatpush3.bf16.msra.mxu1 %v1510_v26 }
 0x196   :  { %1308 = vmatprep.subr.bf16.mxu1 %v1596_v1 }
 0x199   :  { %1309 = vmatpush3.bf16.msra.mxu1 %v1511_v27 }
 0x19a   :  { %1310 = vmatprep.subr.bf16.mxu1 %v1596_v1 }
 0x19d   :  { %1311 = vmatpush3.bf16.msra.mxu1 %v1512_v28 }
 0x19e   :  { %1312 = vmatprep.subr.bf16.mxu1 %v1596_v1 }
 0x1a1   :  { %1313 = vmatpush3.bf16.msra.mxu1 %v1513_v29 }
 0x1a2   :  { %1314 = vmatprep.subr.bf16.mxu1 %v1596_v1 }
 0x1a5   :  { %1315 = vmatpush3.bf16.msra.mxu1 %v1514_v30 }
 0x1a6   :  { %1316 = vmatprep.subr.bf16.mxu1 %v1596_v1 }
 0x1a9   :  { %1317 = vmatpush3.bf16.msra.mxu1 %v1515_v31 }
 0x1aa   :  { %1318 = vmatprep.subr.bf16.mxu1 %v1596_v1 }
 0x1ad   :  { %1319 = vmatpush3.bf16.msra.mxu1 %v1516_v32 }
 0x263   :  { %v1289_v33 = vpop.f32.mrb[4].mxu1 }
 0x264   :  { %v1290_v35 = vpop.f32.mrb[5].mxu1 }
 0x265   :  { %v1291_v36 = vadd.f32 %v1290_v35, %v1289_v33  ;;  %v1292_v37 = vpop.f32.mrb[6].mxu1 }
 0x266   :  { %v1293_v38 = vpop.f32.mrb[7].mxu1 }
 0x267   :  { %v1012_v39 = vadd.f32 %v1291_v36, %v1247_v34 }
 0x269   :  { %v1017_v40 = vmax.f32 %v1012_v39, 0.0 }
 0x26b   :  { %v1018_v41 = vpack.c.bf16 %v1017_v40, %v1017_v40 }
 0x26d   :  { %1321 = vmatmul.mubr.bf16.vlgmr.msra.gmra.mrb[8].mxu1 %v1018_v41 }
 0x340   :  { %v1124_v43 = vpop.f32.mrb[8].mxu1 }
 0x341   :  { %v1125_v44 = vadd.f32 %v1264_v42, %v1124_v43  ;;  %v1322_v45 = vpop.f32.mrb[9].mxu1 }
 0x342   :  { %v1127_v46 = vpop.f32.mrb[10].mxu1 }
 0x343   :  { %v1323_v47 = vpop.f32.mrb[11].mxu1  ;;  %1131 = vst.msk [vmem:[#allocation7] sm:$0xff] %vm1130_vm2, %v1125_v44 }
 0x344   :  { %1572 = shalt.err (!%p1569_p6)
}
 0x345   :  { %s1573_s6 = scalar_lea.hbm %s1736_s7, 128 }
 0x346   :  { %p1574_p7 = scmp.ne.s32.totalorder %s1736_s7, %s1573_s6  ;;  %p1577_p8 = scmp.lt.u32.totalorder %s1573_s6, %s1736_s7 }
 0x348   :  { %p1579_p9 = pnand %p1577_p8, %p1574_p7 }
 0x34a   :  { %1582 = shalt.err (!%p1579_p9)
}
 0x34b   :  { %1141 = dma.vmem_to_hbm [thread:$0]  %s1139_s13, 128, %s1736_s7, [#allocation4]  }
 0x34c   :  { %1587 = dma.done.wait [#allocation4], 128  }
 0x34d   :  { %1588 = vsyncadd [#allocation4], 4294967168 }
 0x34e   :  { %1145 = vsyncpa [#allocation3], 1 }
 0x34f   :  { %1146 = vsyncpa [#allocation6], 1 }
 0x350   :  { %1147 = vsyncpa [#allocation4], 1 }

</bundles_post_ra>
